<compile_context>
chip_gen: v7x
topology: tpu7x:2x2x1
jax: 0.10.0
libtpu: 0.0.40
codegen_flags: <defaults>
</compile_context>

<pallas_src>
import jax
import jax.numpy as jnp
from jax.experimental import pallas as pl
from jax.experimental.pallas import tpu as pltpu


def _round_up(x, m):
    return (x + m - 1) // m * m


def mlp_kernel(x_ref, w1_ref, b1_ref, w2_ref, b2_ref, o_ref):
    # x_ref:  (TN, Fp) bf16     w1_ref: (Fp, Hp) bf16   b1_ref: (1, Hp) f32
    # w2_ref: (Hp, Cp) bf16     b2_ref: (1, Cp)  f32    o_ref:  (TN, Cp) f32
    # TODO(synk): training-mode dropout not implemented (eval semantics: identity).
    x = x_ref[...]
    # First matmul on the MXU: bf16 inputs, f32 accumulation.
    h = jnp.dot(x, w1_ref[...], preferred_element_type=jnp.float32)
    h = h + b1_ref[...]            # f32 bias row-add (implicit broadcast)
    h = jnp.maximum(h, 0.0)        # ReLU in f32
    # Second matmul: downcast activations to bf16 (deliberate precision choice).
    o = jnp.dot(h.astype(jnp.bfloat16), w2_ref[...],
                preferred_element_type=jnp.float32)
    o = o + b2_ref[...]
    o_ref[...] = o.astype(o_ref.dtype)


def mlp_forward(x, w1, b1, w2, b2, *, row_tile=256):
    """x: [N, F] float32.  w1: [F, H], b1: [H], w2: [H, C], b2: [C]."""
    N, F = x.shape
    H = w1.shape[1]
    C = w2.shape[1]

    # Lane-dense padding of feature dims; row padding to the row tile.
    Fp = _round_up(F, 128)
    Hp = _round_up(H, 128)
    Cp = _round_up(C, 128)

    row_tile = _round_up(max(8, row_tile), 8)
    row_tile = min(row_tile, _round_up(N, 8))
    Np = _round_up(N, row_tile)

    # Zero-pad (exact for matmul + bias + ReLU) and cast matmul operands to bf16.
    xp = jnp.zeros((Np, Fp), jnp.bfloat16).at[:N, :F].set(x.astype(jnp.bfloat16))
    w1p = jnp.zeros((Fp, Hp), jnp.bfloat16).at[:F, :H].set(w1.astype(jnp.bfloat16))
    w2p = jnp.zeros((Hp, Cp), jnp.bfloat16).at[:H, :C].set(w2.astype(jnp.bfloat16))
    b1p = jnp.zeros((1, Hp), jnp.float32).at[0, :H].set(b1.astype(jnp.float32))
    b2p = jnp.zeros((1, Cp), jnp.float32).at[0, :C].set(b2.astype(jnp.float32))

    grid = (Np // row_tile,)

    # Explicit VMEM budget: double-buffered x/out tiles + resident weights/biases
    # + f32 intermediate. Cap at 48 MiB (safe on v7x's 64 MiB VMEM per TC).
    est_bytes = (
        2 * row_tile * Fp * 2          # x tiles (bf16, 2 buffers)
        + 2 * row_tile * Cp * 4        # out tiles (f32, 2 buffers)
        + 2 * (Fp * Hp + Hp * Cp) * 2  # weights (bf16, 2 buffers each)
        + 2 * (Hp + Cp) * 4            # biases (f32)
        + row_tile * Hp * 4            # f32 intermediate h
    )
    vmem_limit = int(min(max(2 * est_bytes, 32 * 1024 * 1024), 48 * 1024 * 1024))

    out_padded = pl.pallas_call(
        mlp_kernel,
        out_shape=jax.ShapeDtypeStruct((Np, Cp), jnp.float32),
        grid_spec=pltpu.PrefetchScalarGridSpec(
            num_scalar_prefetch=0,
            grid=grid,
            in_specs=[
                pl.BlockSpec((row_tile, Fp), lambda i: (i, 0)),  # x rows (streamed)
                pl.BlockSpec((Fp, Hp), lambda i: (0, 0)),        # w1 (grid-invariant)
                pl.BlockSpec((1, Hp), lambda i: (0, 0)),         # b1
                pl.BlockSpec((Hp, Cp), lambda i: (0, 0)),        # w2 (grid-invariant)
                pl.BlockSpec((1, Cp), lambda i: (0, 0)),         # b2
            ],
            out_specs=pl.BlockSpec((row_tile, Cp), lambda i: (i, 0)),
        ),
        compiler_params=pltpu.CompilerParams(
            dimension_semantics=("parallel",),
            vmem_limit_bytes=vmem_limit,
        ),
    )(xp, w1p, b1p, w2p, b2p)

    return out_padded[:N, :C].astype(x.dtype)


def init_linear_params(key, fan_in, fan_out, dtype=jnp.float32):
    """Deterministic init mimicking torch.nn.Linear defaults:
    weight ~ U(-1/sqrt(fan_in), 1/sqrt(fan_in)), bias likewise."""
    kw, kb = jax.random.split(key)
    bound = 1.0 / (fan_in ** 0.5)
    # stored directly as [in, out] (transposed vs. PyTorch's [out, in])
    w = jax.random.uniform(kw, (fan_in, fan_out), dtype, -bound, bound)
    b = jax.random.uniform(kb, (fan_out,), dtype, -bound, bound)
    return w, b


def mlp_reference_f32(x, w1, b1, w2, b2):
    h = jnp.maximum(x @ w1 + b1, 0.0)
    return h @ w2 + b2


def mlp_reference_bf16(x, w1, b1, w2, b2):
    # Same precision policy as the kernel: bf16 MXU inputs, f32 accumulation.
    xb = x.astype(jnp.bfloat16)
    w1b = w1.astype(jnp.bfloat16)
    w2b = w2.astype(jnp.bfloat16)
    h = jnp.dot(xb, w1b, preferred_element_type=jnp.float32) + b1
    h = jnp.maximum(h, 0.0)
    return jnp.dot(h.astype(jnp.bfloat16), w2b,
                   preferred_element_type=jnp.float32) + b2


if __name__ == "__main__":
    # Small shapes consistent with the module:
    #   N nodes = 512, num_features = 16, hidden = 32, num_classes = 8
    # (512 rows with row_tile=256 gives a 2-step parallel grid -> both v7x TCs busy.)
    N, F, H, C = 512, 16, 32, 8

    key = jax.random.PRNGKey(0)
    kx, k1, k2 = jax.random.split(key, 3)

    x = jax.random.normal(kx, (N, F), jnp.float32)
    w1, b1 = init_linear_params(k1, F, H)
    w2, b2 = init_linear_params(k2, H, C)

    out = mlp_forward(x, w1, b1, w2, b2)
    out = jax.block_until_ready(out)

    assert out.shape == (N, C)
    assert out.dtype == x.dtype

    # Tight check against a precision-matched (bf16-input, f32-accumulate) reference.
    ref_bf16 = mlp_reference_bf16(x, w1, b1, w2, b2)
    assert jnp.allclose(out, ref_bf16, atol=1e-2, rtol=1e-2), \
        "mismatch vs bf16-matched reference"

    # Looser sanity check against the pure-f32 PyTorch-equivalent math.
    ref_f32 = mlp_reference_f32(x, w1, b1, w2, b2)
    assert jnp.allclose(out, ref_f32, atol=5e-2, rtol=5e-2), \
        "mismatch vs f32 reference"

    print("KERNEL_OK")
</pallas_src>

<mosaic_0001>
module attributes {stable_mosaic.version = 11 : i64} {
  func.func @mlp_kernel(%arg0: i32, %arg1: memref<256x128xbf16, #tpu.memory_space<vmem>>, %arg2: memref<128x128xbf16, #tpu.memory_space<vmem>>, %arg3: memref<1x128xf32, #tpu.memory_space<vmem>>, %arg4: memref<128x128xbf16, #tpu.memory_space<vmem>>, %arg5: memref<1x128xf32, #tpu.memory_space<vmem>>, %arg6: memref<256x128xf32, #tpu.memory_space<vmem>>) attributes {dimension_semantics = [#tpu.dimension_semantics<parallel>], iteration_bounds = array<i64: 2>, scalar_prefetch = 0 : i64, scratch_operands = 0 : i64, tpu.core_type = #tpu.core_type<tc>, window_params = [{transform_indices = @transform_0, window_bounds = array<i64: 256, 128>}, {pipeline_mode = #tpu.pipeline_mode<synchronous>, transform_indices = @transform_1, window_bounds = array<i64: 128, 128>}, {pipeline_mode = #tpu.pipeline_mode<synchronous>, transform_indices = @transform_2, window_bounds = array<i64: 1, 128>}, {pipeline_mode = #tpu.pipeline_mode<synchronous>, transform_indices = @transform_3, window_bounds = array<i64: 128, 128>}, {pipeline_mode = #tpu.pipeline_mode<synchronous>, transform_indices = @transform_4, window_bounds = array<i64: 1, 128>}, {transform_indices = @transform_5, window_bounds = array<i64: 256, 128>}]} {
    %c0 = arith.constant 0 : index
    %c0_0 = arith.constant 0 : index
    %0 = vector.load %arg1[%c0, %c0_0] : memref<256x128xbf16, #tpu.memory_space<vmem>>, vector<256x128xbf16>
    %c0_1 = arith.constant 0 : index
    %c0_2 = arith.constant 0 : index
    %1 = vector.load %arg2[%c0_1, %c0_2] : memref<128x128xbf16, #tpu.memory_space<vmem>>, vector<128x128xbf16>
    %cst = arith.constant dense<0.000000e+00> : vector<256x128xf32>
    %2 = tpu.matmul %0, %1, %cst {dimension_numbers = #tpu.dot_dimension_numbers<[1], [0], [0], [1], [0, 0, 1, 1], [], []>} : vector<256x128xbf16>, vector<128x128xbf16>, vector<256x128xf32> -> vector<256x128xf32>
    %c0_3 = arith.constant 0 : index
    %c0_4 = arith.constant 0 : index
    %3 = vector.load %arg3[%c0_3, %c0_4] : memref<1x128xf32, #tpu.memory_space<vmem>>, vector<1x128xf32>
    %4 = vector.broadcast %3 : vector<1x128xf32> to vector<256x128xf32>
    %5 = arith.addf %2, %4 : vector<256x128xf32>
    %cst_5 = arith.constant 0.000000e+00 : f32
    %6 = vector.broadcast %cst_5 : f32 to vector<256x128xf32>
    %7 = arith.maximumf %5, %6 : vector<256x128xf32>
    %8 = arith.truncf %7 : vector<256x128xf32> to vector<256x128xbf16>
    %c0_6 = arith.constant 0 : index
    %c0_7 = arith.constant 0 : index
    %9 = vector.load %arg4[%c0_6, %c0_7] : memref<128x128xbf16, #tpu.memory_space<vmem>>, vector<128x128xbf16>
    %cst_8 = arith.constant dense<0.000000e+00> : vector<256x128xf32>
    %10 = tpu.matmul %8, %9, %cst_8 {dimension_numbers = #tpu.dot_dimension_numbers<[1], [0], [0], [1], [0, 0, 1, 1], [], []>} : vector<256x128xbf16>, vector<128x128xbf16>, vector<256x128xf32> -> vector<256x128xf32>
    %c0_9 = arith.constant 0 : index
    %c0_10 = arith.constant 0 : index
    %11 = vector.load %arg5[%c0_9, %c0_10] : memref<1x128xf32, #tpu.memory_space<vmem>>, vector<1x128xf32>
    %12 = vector.broadcast %11 : vector<1x128xf32> to vector<256x128xf32>
    %13 = arith.addf %10, %12 : vector<256x128xf32>
    %c0_11 = arith.constant 0 : index
    %c0_12 = arith.constant 0 : index
    %14 = vector.load %arg6[%c0_11, %c0_12] : memref<256x128xf32, #tpu.memory_space<vmem>>, vector<256x128xf32>
    tpu.vector_store %arg6[%c0_11, %c0_12], %13 {strides = array<i32>} : memref<256x128xf32, #tpu.memory_space<vmem>>, vector<256x128xf32>,
    return
  }
  func.func @transform_0(%arg0: i32) -> (i32, i32) {
    %c0_i32 = arith.constant 0 : i32
    %c0_i32_0 = arith.constant 0 : i32
    return %arg0, %c0_i32 : i32, i32
  }
  func.func @transform_1(%arg0: i32) -> (i32, i32) {
    %c0_i32 = arith.constant 0 : i32
    %c0_i32_0 = arith.constant 0 : i32
    %c0_i32_1 = arith.constant 0 : i32
    return %c0_i32, %c0_i32_0 : i32, i32
  }
  func.func @transform_2(%arg0: i32) -> (i32, i32) {
    %c0_i32 = arith.constant 0 : i32
    %c0_i32_0 = arith.constant 0 : i32
    %c0_i32_1 = arith.constant 0 : i32
    return %c0_i32, %c0_i32_0 : i32, i32
  }
  func.func @transform_3(%arg0: i32) -> (i32, i32) {
    %c0_i32 = arith.constant 0 : i32
    %c0_i32_0 = arith.constant 0 : i32
    %c0_i32_1 = arith.constant 0 : i32
    return %c0_i32, %c0_i32_0 : i32, i32
  }
  func.func @transform_4(%arg0: i32) -> (i32, i32) {
    %c0_i32 = arith.constant 0 : i32
    %c0_i32_0 = arith.constant 0 : i32
    %c0_i32_1 = arith.constant 0 : i32
    return %c0_i32, %c0_i32_0 : i32, i32
  }
  func.func @transform_5(%arg0: i32) -> (i32, i32) {
    %c0_i32 = arith.constant 0 : i32
    %c0_i32_0 = arith.constant 0 : i32
    return %arg0, %c0_i32 : i32, i32
  }
}

</mosaic_0001>

<bundles_post_ra>
// kernel: tpu_custom_call.1
= control target key start
LH: loop header
LB: loop body
LE: loop exit
PB: predicated region body
PF: predicated region fallthrough
CT: control target
= control target key end

     0   :  { %10 = vsyncpa [#allocation3], 0  ;;  %s1921_s0 = inlined_call_operand.hbm [shape: bf16[512,128], index: 0, kind: input, shape index: {}]   ;;  %s1922_s1 = inlined_call_operand.hbm [shape: bf16[128,128], index: 1, kind: input, shape index: {}]   ;;  %s1923_s2 = inlined_call_operand.vmem [shape: f32[1,128], index: 2, kind: input, shape index: {}]   ;;  %s1924_s3 = inlined_call_operand.hbm [shape: bf16[128,128], index: 3, kind: input, shape index: {}]   ;;  %s1925_s4 = inlined_call_operand.vmem [shape: f32[1,128], index: 4, kind: input, shape index: {}]   ;;  %s1926_s5 = inlined_call_operand.hbm [shape: f32[512,128], index: 5, kind: output, shape index: {}]  }
   0x1   :  { %12 = vsyncpa [#allocation3 + $0x1], 0 }
   0x2   :  { %13 = vsyncpa [#allocation6], 0 }
   0x3   :  { %14 = vsyncpa [#allocation4], 0 }
   0x4   :  { %16 = vsyncpa [#allocation4 + $0x1], 0  ;;  %s1550_s18 = smov 0   ;;  %s1552_s19 = smov 0  }
   0x5   :  { %s1554_s20 = smov 0   ;;  %s1556_s21 = smov 0  }
   0x6 LB: > { %s1571_s22 = sadd.s32 4294967295, %s1510_s21   ;;  %s1053_s23 = sadd.s32 4294967294, %s1510_s21   ;;  %s1510_s21 = sphi %s1556_s21, %s1946_s21   ;;  %s1506_s20 = sphi %s1554_s20, %s1945_s20   ;;  %s1502_s19 = sphi %s1552_s19, %s1944_s19   ;;  %s1498_s18 = sphi %s1550_s18, %s1943_s18  }
   0x7   : > { %p42_p0 = scmp.ne.s32.totalorder %s1502_s19, %s1498_s18  ;;  %p1927_p1 = scmp.eq.s32.totalorder %s1571_s22, 0 }
   0x8   : > { %p156_p3 = scmp.eq.s32.totalorder %s1053_s23, 1  ;;  %p1054_p5 = scmp.ge.s32.totalorder %s1510_s21, 1 }
   0x9   : > { %p1580_p4 = por %p1927_p1, %p42_p0  ;;  %p163_p7 = scmp.lt.s32.totalorder %s1510_s21, 3 }
   0xa   : > { %p1585_p6 = por %p156_p3, %p42_p0  ;;  %s1512_s27 = smov [#allocation5]  }
   0xb   : > { %s1930_s24 = scalar_select %p1580_p4, 1, 0 }
   0xc   : > { %s1931_s25 = scalar_select %p1585_p6, 1, 0 }
   0xd   : > { %p1590_p8 = pnand %p1054_p5, %p163_p7  ;;  %s175_s28 = sshll.u32 %s1512_s27, 4  ;;  %s1594_s28 = int_to_ptr.vmem [resolvable:$true] %s175_s28 }
   0xe   : > { %s1513_s30 = smov [#allocation7]   ;;  %s1354_s9 = scalar_lea.hbm %s1922_s1, 1024 }
   0xf   : > { %p1263_p9 = pneg %p1590_p8  ;;  %s191_s6 = sshll.u32 %s1513_s30, 4  ;;  %s1605_s6 = int_to_ptr.vmem [resolvable:$true] %s191_s6 }
  0x10   : > { %p1355_p12 = scmp.ne.s32.totalorder %s1922_s1, %s1354_s9  ;;  %p1361_p5 = scmp.lt.u32.totalorder %s1354_s9, %s1922_s1 }
  0x11   : > { %p1601_p11 = pnand %p1263_p9, %p1927_p1 }
  0x13   : > { %p1356_p13 = pneg %p1601_p11 }
  0x15   : > { %p1357_p0 = pnand %p1356_p13, %p1355_p12 }
  0x17   : > { %p1358_p3 = pneg %p1357_p0 }
  0x19   : > { %p1363_p7 = pnand %p1361_p5, %p1358_p3 }
  0x1b   : > { %1366 = shalt.err (!%p1363_p7)
}
  0x1c   : > { %s1367_s14 = scalar_lea.vmem %s1594_s28, 1024  ;;  %p1375_p2 = scmp.lt.s32.totalorder %s1594_s28, %s1594_s28 }
  0x1d   : > { %p1368_p9 = scmp.ne.s32.totalorder %s1594_s28, %s1367_s14  ;;  %p1376_p12 = scmp.lt.s32.totalorder %s1367_s14, %s1367_s14 }
  0x1f   : > { %p1370_p10 = pnand %p1368_p9, %p1356_p13  ;;  %p1377_p0 = por %p1376_p12, %p1375_p2 }
  0x21   : > { %p1371_p1 = pneg %p1370_p10 }
  0x23   : > { %p1378_p6 = pnand %p1377_p0, %p1371_p1 }
  0x25   : > { %1381 = shalt.err (!%p1378_p6)
}
  0x26   : > { %s1514_s15 = smov 64   ;;  %s1515_s16 = smov 4  }
  0x27   : > { %1266 = dma.hbm_to_vmem [thread:$0]  (!%p1601_p11), %s1922_s1, 1024, %s1594_s28, [#allocation6], %s1514_s15, %s1514_s15, %s1515_s16  }
  0x28   : > { %s1382_s7 = scalar_lea.hbm %s1924_s3, 1024 }
  0x29   : > { %p1383_p1 = scmp.ne.s32.totalorder %s1924_s3, %s1382_s7  ;;  %p1389_p10 = scmp.lt.u32.totalorder %s1382_s7, %s1924_s3 }
  0x2b   : > { %p1385_p2 = pnand %p1383_p1, %p1356_p13 }
  0x2d   : > { %p1386_p6 = pneg %p1385_p2 }
  0x2f   : > { %p1391_p3 = pnand %p1389_p10, %p1386_p6 }
  0x31   : > { %1394 = shalt.err (!%p1391_p3)
}
  0x32   : > { %s1395_s28 = scalar_lea.vmem %s1605_s6, 1024  ;;  %p1403_p12 = scmp.lt.s32.totalorder %s1605_s6, %s1605_s6 }
  0x33   : > { %p1396_p5 = scmp.ne.s32.totalorder %s1605_s6, %s1395_s28  ;;  %p1404_p0 = scmp.lt.s32.totalorder %s1395_s28, %s1395_s28 }
  0x35   : > { %p1398_p7 = pnand %p1396_p5, %p1356_p13  ;;  %p1405_p1 = por %p1404_p0, %p1403_p12 }
  0x37   : > { %p1399_p9 = pneg %p1398_p7 }
  0x39   : > { %p1406_p2 = pnand %p1405_p1, %p1399_p9 }
  0x3b   : > { %1409 = shalt.err (!%p1406_p2)
}
  0x3c   : > { %1269 = dma.hbm_to_vmem [thread:$0]  (!%p1601_p11), %s1924_s3, 1024, %s1605_s6, [#allocation6], %s1514_s15, %s1514_s15, %s1515_s16  }
  0x3d   : > { %s1666_s29 = sadd.s32 1, %s1510_s21   ;;  %s29_s14 = sadd.s32 1, %s1506_s20 }
  0x3e   : > { %s26_s17 = ssub.s32 %s1510_s21, %s1666_s29  ;;  %p36_p13 = scmp.ne.s32.totalorder %s1506_s20, %s1502_s19 }
  0x3f   : > { %p27_p6 = scmp.eq.s32.totalorder %s26_s17, 0  ;;  %p37_p10 = scmp.eq.s32.totalorder %s1510_s21, 0 }
  0x40   : > { %p1934_p3 = scmp.eq.s32.totalorder %s1571_s22, 1  ;;  %p1280_p7 = scmp.lt.s32.totalorder %s1510_s21, 2 }
  0x41   : > { %s1682_s27 = scalar_select %p27_p6, %s1506_s20, %s29_s14  }
  0x42   : > { %p1676_p5 = por %p1934_p3, %p36_p13  ;;  %p38_p9 = por %p37_p10, %p36_p13 }
  0x43   : > { %s208_s30 = sand.u32 1, %s1506_s20   ;;  %s1105_s6 = sshll.u32 %s1510_s21, 11 }
  0x44   : > { %s1935_s23 = scalar_select %p1676_p5, 1, 0 }
  0x45   : > { %s1058_s7 = sshll.u32 %s208_s30, 7  ;;  %s1689_s10 = scalar_lea.hbm %s1921_s0, %s1105_s6 }
  0x46   : > { %s212_s11 = scalar_lea.vmem [#allocation2], %s1058_s7  ;;  %p1693_p11 = pnand %p1280_p7, %p38_p9 }
  0x47   : > { %s219_s28 = sshll.u32 %s212_s11, 4  ;;  %s1697_s13 = scalar_lea.sflag [#allocation3], %s208_s30  ;;  %s1691_s28 = int_to_ptr.vmem [resolvable:$true] %s219_s28 }
  0x48   : > { %s1410_s14 = scalar_lea.hbm %s1689_s10, 2048  ;;  %p1412_p0 = pneg %p1693_p11 }
  0x49   : > { %p1411_p12 = scmp.ne.s32.totalorder %s1689_s10, %s1410_s14  ;;  %s1415_s6 = scalar_lea.hbm %s1921_s0, 4096 }
  0x4a   : > { %p1416_p13 = scmp.lt.u32.totalorder %s1689_s10, %s1921_s0  ;;  %p1417_p6 = scmp.lt.u32.totalorder %s1415_s6, %s1410_s14 }
  0x4b   : > { %p1413_p1 = pnand %p1412_p0, %p1411_p12  ;;  %p1419_p3 = scmp.lt.u32.totalorder %s1410_s14, %s1689_s10 }
  0x4c   : > { %p1418_p10 = por %p1417_p6, %p1416_p13 }
  0x4d   : > { %p1414_p2 = pneg %p1413_p1 }
  0x4e   : > { %p1420_p7 = por %p1419_p3, %p1418_p10 }
  0x50   : > { %p1421_p9 = pnand %p1420_p7, %p1414_p2 }
  0x52   : > { %1424 = shalt.err (!%p1421_p9)
}
  0x53   : > { %s1425_s30 = scalar_lea.vmem %s1691_s28, 2048  ;;  %s1516_s11 = smov [#allocation2]  }
  0x54   : > { %p1426_p12 = scmp.ne.s32.totalorder %s1691_s28, %s1425_s30  ;;  %s1430_s17 = sshll.u32 %s1516_s11, 4  ;;  %s1431_s17 = int_to_ptr.vmem [resolvable:$false] %s1430_s17 }
  0x55   : > { %s1432_s7 = scalar_lea.vmem %s1431_s17, 4096  ;;  %p1433_p4 = scmp.lt.s32.totalorder %s1691_s28, %s1431_s17 }
  0x56   : > { %p1428_p1 = pnand %p1426_p12, %p1412_p0  ;;  %p1434_p13 = scmp.lt.s32.totalorder %s1432_s7, %s1425_s30 }
  0x58   : > { %p1429_p5 = pneg %p1428_p1  ;;  %p1435_p6 = por %p1434_p13, %p1433_p4 }
  0x5a   : > { %p1436_p10 = pnand %p1435_p6, %p1429_p5 }
  0x5c   : > { %1439 = shalt.err (!%p1436_p10)
}
  0x5d   : > { %1273 = dma.hbm_to_vmem [thread:$0]  (!%p1693_p11), %s1689_s10, 2048, %s1691_s28, %s1697_s13, %s1514_s15, %s1514_s15, %s1515_s16  }
  0x5e   : > { %231 = sbr.rel (%p1590_p8) target bundleno = 648 (0x288), region = 40  ;;  %s1731_s14 = sand.u32 (!%p1590_p8), 1, %s1502_s19  }
  0x5f   : > { %s1062_s6 = sshll.u32 (!%p1590_p8), %s1731_s14, 7  ;;  %s234_s8 = scalar_lea.sflag (!%p1590_p8), [#allocation3], %s1731_s14 }
  0x60   : > { %s1735_s9 = scalar_lea.vmem (!%p1590_p8), [#allocation2], %s1062_s6  ;;  %p1937_p4 = scmp.ne.s32.totalorder (!%p1590_p8), %s1930_s24, 0 }
  0x65   : > { %1485 = dma.done.wait (%p1937_p4), %s234_s8, 2048  }
  0x66   : > { %1487 = vsyncadd (%p1937_p4), %s234_s8, 4294965248  ;;  %p1938_p5 = scmp.eq.s32.totalorder %s1571_s22, 0 }
  0x68   : > { %1489 = dma.done.wait (%p1938_p5), [#allocation6], 2048   ;;  %p1939_p8 = pmov %p1938_p5 }
  0x69   : > { %v1322_v0 = vld [vmem:[#allocation5] sm:$0xff]   ;;  %v1323_v1 = vld [vmem:[#allocation5 + $0x8] sm:$0xff]   ;;  %v1324_v2 = vld [vmem:[#allocation5 + $0x10] sm:$0xff]   ;;  %s1065_s15 = sshll.u32 %s1731_s14, 8  ;;  %s1106_s12 = sshll.u32 %s1571_s22, 12 }
  0x6a   : > { %1491 = vsyncadd (%p1939_p8), [#allocation6], 4294965248  ;;  %1155 = vmatprep.subr.bf16.mxu0 %v1322_v0  ;;  %v1325_v3 = vld [vmem:[#allocation5 + $0x18] sm:$0xff]   ;;  %v1330_v4 = vld [vmem:[%s1735_s9] sm:$0xff]   ;;  %s1806_s28 = scalar_lea.vmem [#allocation8], %s1065_s15  ;;  %s1871_s17 = scalar_lea.hbm %s1926_s5, %s1106_s12 }
  0x6b   : > { %1156 = vmatpush3.bf16.msra.mxu0 %v1322_v0  ;;  %1171 = vmatprep.mubr.bf16.mxu0 %v1330_v4  ;;  %v1326_v5 = vld [vmem:[#allocation5 + $0x20] sm:$0xff]   ;;  %v1327_v6 = vld [vmem:[#allocation5 + $0x28] sm:$0xff]   ;;  %v1328_v7 = vld [vmem:[#allocation5 + $0x30] sm:$0xff]   ;;  %s961_s13 = sshll.u32 %s1806_s28, 4  ;;  %s948_s22 = scalar_lea.sflag [#allocation4], %s1731_s14  ;;  %s1873_s13 = int_to_ptr.vmem [resolvable:$true] %s961_s13 }
  0x6c   : > { %1157 = vmatprep.subr.bf16.mxu0 %v1323_v1  ;;  %v1329_v8 = vld [vmem:[#allocation5 + $0x38] sm:$0xff]   ;;  %v1346_v9 = vld [vmem:[#allocation7] sm:$0xff]   ;;  %v1347_v10 = vld [vmem:[#allocation7 + $0x8] sm:$0xff]   ;;  %s1440_s7 = scalar_lea.vmem %s1873_s13, 4096  ;;  %p1940_p0 = scmp.ne.s32.totalorder %s1935_s23, 0 }
  0x6d   : > { %1203 = vmatprep.subr.bf16.mxu1 %v1346_v9  ;;  %v1348_v11 = vld [vmem:[#allocation7 + $0x10] sm:$0xff]   ;;  %v1331_v12 = vld [vmem:[%s1735_s9 + $0x8] sm:$0xff]   ;;  %v1349_v14 = vld [vmem:[#allocation7 + $0x18] sm:$0xff]   ;;  %p1441_p11 = scmp.ne.s32.totalorder %s1873_s13, %s1440_s7  ;;  %s1517_s6 = smov [#allocation8]  }
  0x6e   : > { %1204 = vmatpush3.bf16.msra.mxu1 %v1346_v9  ;;  %v1332_v13 = vld [vmem:[%s1735_s9 + $0x10] sm:$0xff]   ;;  %v1350_v15 = vld [vmem:[#allocation7 + $0x20] sm:$0xff]   ;;  %v1333_v16 = vld [vmem:[%s1735_s9 + $0x18] sm:$0xff]   ;;  %s1444_s8 = sshll.u32 %s1517_s6, 4  ;;  %s1445_s8 = int_to_ptr.vmem [resolvable:$false] %s1444_s8 }
  0x6f   : > { %1158 = vmatpush3.bf16.msra.mxu0 %v1323_v1  ;;  %1205 = vmatprep.subr.bf16.mxu1 %v1347_v10  ;;  %v1334_v17 = vld [vmem:[%s1735_s9 + $0x20] sm:$0xff]   ;;  %v1351_v18 = vld [vmem:[#allocation7 + $0x28] sm:$0xff]   ;;  %v1336_v20 = vld [vmem:[%s1735_s9 + $0x30] sm:$0xff]   ;;  %p1442_p2 = pnand %p1441_p11, %p1940_p0  ;;  %p1447_p7 = scmp.lt.s32.totalorder %s1873_s13, %s1445_s8 }
  0x70   : > { %1159 = vmatprep.subr.bf16.mxu0 %v1324_v2  ;;  %v1335_v19 = vld [vmem:[%s1735_s9 + $0x28] sm:$0xff]   ;;  %v1337_v21 = vld [vmem:[%s1735_s9 + $0x38] sm:$0xff]   ;;  %v1338_v22 = vld [vmem:[%s1735_s9 + $0x40] sm:$0xff]  }
  0x71   : > { %v1339_v23 = vld [vmem:[%s1735_s9 + $0x48] sm:$0xff]   ;;  %v1340_v24 = vld [vmem:[%s1735_s9 + $0x50] sm:$0xff]   ;;  %v1341_v25 = vld [vmem:[%s1735_s9 + $0x58] sm:$0xff]   ;;  %p1443_p3 = pneg %p1442_p2 }
  0x72   : > { %1206 = vmatpush3.bf16.msra.mxu1 %v1347_v10  ;;  %v1342_v26 = vld [vmem:[%s1735_s9 + $0x60] sm:$0xff]   ;;  %v1343_v27 = vld [vmem:[%s1735_s9 + $0x68] sm:$0xff]   ;;  %v1344_v28 = vld [vmem:[%s1735_s9 + $0x70] sm:$0xff]  }
  0x73   : > { %1160 = vmatpush3.bf16.msra.mxu0 %v1324_v2  ;;  %1207 = vmatprep.subr.bf16.mxu1 %v1348_v11  ;;  %v1345_v29 = vld [vmem:[%s1735_s9 + $0x78] sm:$0xff]   ;;  %v1352_v30 = vld [vmem:[#allocation7 + $0x30] sm:$0xff]   ;;  %v1764_v32 = vld [vmem:[%s1923_s2] ss:$0 sm:$0xff]  ;;  %s1446_s9 = scalar_lea.vmem %s1445_s8, 8192 }
  0x74   : > { %1161 = vmatprep.subr.bf16.mxu0 %v1325_v3  ;;  %v1353_v31 = vld [vmem:[#allocation7 + $0x38] sm:$0xff]   ;;  %p1448_p9 = scmp.lt.s32.totalorder %s1446_s9, %s1440_s7 }
  0x76   : > { %1208 = vmatpush3.bf16.msra.mxu1 %v1348_v11  ;;  %p1449_p12 = por %p1448_p9, %p1447_p7 }
  0x77   : > { %1162 = vmatpush3.bf16.msra.mxu0 %v1325_v3  ;;  %1209 = vmatprep.subr.bf16.mxu1 %v1349_v14 }
  0x78   : > { %1163 = vmatprep.subr.bf16.mxu0 %v1326_v5  ;;  %p1450_p1 = pnand %p1449_p12, %p1443_p3 }
  0x7a   : > { %1210 = vmatpush3.bf16.msra.mxu1 %v1349_v14 }
  0x7b   : > { %1164 = vmatpush3.bf16.msra.mxu0 %v1326_v5  ;;  %1211 = vmatprep.subr.bf16.mxu1 %v1350_v15 }
  0x7c   : > { %1165 = vmatprep.subr.bf16.mxu0 %v1327_v6 }
  0x7e   : > { %1212 = vmatpush3.bf16.msra.mxu1 %v1350_v15 }
  0x7f   : > { %1166 = vmatpush3.bf16.msra.mxu0 %v1327_v6  ;;  %1213 = vmatprep.subr.bf16.mxu1 %v1351_v18 }
  0x80   : > { %1167 = vmatprep.subr.bf16.mxu0 %v1328_v7 }
  0x82   : > { %1214 = vmatpush3.bf16.msra.mxu1 %v1351_v18 }
  0x83   : > { %1168 = vmatpush3.bf16.msra.mxu0 %v1328_v7  ;;  %1215 = vmatprep.subr.bf16.mxu1 %v1352_v30 }
  0x84   : > { %1169 = vmatprep.subr.bf16.mxu0 %v1329_v8 }
  0x86   : > { %1216 = vmatpush3.bf16.msra.mxu1 %v1352_v30 }
  0x87   : > { %1170 = vmatpush3.bf16.msra.mxu0 %v1329_v8  ;;  %1217 = vmatprep.subr.bf16.mxu1 %v1353_v31 }
  0x8a   : > { %1172 = vmatmul.mubr.bf16.vlgmr.msra.gmra.mrb[0].mxu0 %v1331_v12  ;;  %1218 = vmatpush3.bf16.msra.mxu1 %v1353_v31 }
  0x8b   : > { %1175 = vmatprep.mubr.bf16.mxu0 %v1332_v13 }
  0x92   : > { %1176 = vmatmul.mubr.bf16.gmra.mrb[4].mxu0 %v1333_v16 }
  0x93   : > { %1179 = vmatprep.mubr.bf16.mxu0 %v1334_v17 }
  0x9a   : > { %1180 = vmatmul.mubr.bf16.gmra.mrb[8].mxu0 %v1335_v19 }
  0x9b   : > { %1183 = vmatprep.mubr.bf16.mxu0 %v1336_v20 }
  0xa2   : > { %1184 = vmatmul.mubr.bf16.gmra.mrb[12].mxu0 %v1337_v21 }
  0xa3   : > { %1187 = vmatprep.mubr.bf16.mxu0 %v1338_v22 }
  0xaa   : > { %1188 = vmatmul.mubr.bf16.gmra.mrb[16].mxu0 %v1339_v23 }
  0xab   : > { %1191 = vmatprep.mubr.bf16.mxu0 %v1340_v24 }
  0xb2   : > { %1192 = vmatmul.mubr.bf16.gmra.mrb[20].mxu0 %v1341_v25 }
  0xb3   : > { %1195 = vmatprep.mubr.bf16.mxu0 %v1342_v26 }
  0xba   : > { %1196 = vmatmul.mubr.bf16.gmra.mrb[24].mxu0 %v1343_v27 }
  0xbb   : > { %1199 = vmatprep.mubr.bf16.mxu0 %v1344_v28 }
  0xc2   : > { %1200 = vmatmul.mubr.bf16.gmra.mrb[28].mxu0 %v1345_v29 }
 0x15d   : > { %v1173_v33 = vpop.f32.mrb[0].mxu0 }
 0x15e   : > { %v517_v34 = vadd.f32 %v1173_v33, %v1764_v32  ;;  %v508_v35 = vpop.f32.mrb[1].mxu0 }
 0x15f   : > { %v509_v36 = vadd.f32 %v1764_v32, %v508_v35  ;;  %v1174_v37 = vpop.f32.mrb[2].mxu0 }
 0x160   : > { %v520_v38 = vadd.f32 %v1174_v37, %v1764_v32  ;;  %v511_v39 = vpop.f32.mrb[3].mxu0  ;;  %v637_v41 = vmax.f32 %v517_v34, 0.0 }
 0x161   : > { %v512_v40 = vadd.f32 %v1764_v32, %v511_v39  ;;  %v635_v43 = vmax.f32 %v509_v36, 0.0 }
 0x162   : > { %v638_v42 = vmax.f32 %v520_v38, 0.0 }
 0x163   : > { %v636_v44 = vmax.f32 %v512_v40, 0.0 }
 0x164   : > { %v668_v45 = vpack.c.bf16 %v638_v42, %v637_v41 }
 0x165   : > { %v1177_v46 = vpop.f32.mrb[4].mxu0  ;;  %v667_v47 = vpack.c.bf16 %v636_v44, %v635_v43 }
 0x166   : > { %v533_v48 = vadd.f32 %v1177_v46, %v1764_v32  ;;  %v524_v49 = vpop.f32.mrb[5].mxu0 }
 0x167   : > { %v525_v50 = vadd.f32 %v1764_v32, %v524_v49  ;;  %v1178_v51 = vpop.f32.mrb[6].mxu0  ;;  %1219 = vmatprep.mubr.bf16.mxu1 %v667_v47 }
 0x168   : > { %v536_v52 = vadd.f32 %v1178_v51, %v1764_v32  ;;  %v527_v53 = vpop.f32.mrb[7].mxu0  ;;  %1220 = vmatmul.mubr.bf16.vlgmr.msra.gmra.mrb[0].mxu1 %v668_v45  ;;  %v641_v55 = vmax.f32 %v533_v48, 0.0 }
 0x169   : > { %v528_v54 = vadd.f32 %v1764_v32, %v527_v53  ;;  %v639_v57 = vmax.f32 %v525_v50, 0.0 }
 0x16a   : > { %v642_v56 = vmax.f32 %v536_v52, 0.0 }
 0x16b   : > { %v640_v58 = vmax.f32 %v528_v54, 0.0 }
 0x16c   : > { %v670_v59 = vpack.c.bf16 %v642_v56, %v641_v55 }
 0x16d   : > { %v669_v60 = vpack.c.bf16 %v640_v58, %v639_v57  ;;  %v1181_v61 = vpop.f32.mrb[8].mxu0 }
 0x16e   : > { %v549_v62 = vadd.f32 %v1181_v61, %v1764_v32  ;;  %v540_v63 = vpop.f32.mrb[9].mxu0 }
 0x16f   : > { %v541_v0 = vadd.f32 %v1764_v32, %v540_v63  ;;  %v1182_v1 = vpop.f32.mrb[10].mxu0  ;;  %1223 = vmatprep.mubr.bf16.mxu1 %v669_v60 }
 0x170   : > { %v552_v2 = vadd.f32 %v1182_v1, %v1764_v32  ;;  %v543_v3 = vpop.f32.mrb[11].mxu0  ;;  %1224 = vmatmul.mubr.bf16.gmra.mrb[4].mxu1 %v670_v59  ;;  %v645_v5 = vmax.f32 %v549_v62, 0.0 }
 0x171   : > { %v544_v4 = vadd.f32 %v1764_v32, %v543_v3  ;;  %v643_v7 = vmax.f32 %v541_v0, 0.0 }
 0x172   : > { %v646_v6 = vmax.f32 %v552_v2, 0.0 }
 0x173   : > { %v644_v8 = vmax.f32 %v544_v4, 0.0 }
 0x174   : > { %v672_v9 = vpack.c.bf16 %v646_v6, %v645_v5 }
 0x175   : > { %v671_v10 = vpack.c.bf16 %v644_v8, %v643_v7  ;;  %v1185_v11 = vpop.f32.mrb[12].mxu0 }
 0x176   : > { %v565_v12 = vadd.f32 %v1185_v11, %v1764_v32  ;;  %v556_v13 = vpop.f32.mrb[13].mxu0 }
 0x177   : > { %v557_v14 = vadd.f32 %v1764_v32, %v556_v13  ;;  %v1186_v15 = vpop.f32.mrb[14].mxu0  ;;  %1227 = vmatprep.mubr.bf16.mxu1 %v671_v10 }
 0x178   : > { %v568_v16 = vadd.f32 %v1186_v15, %v1764_v32  ;;  %v559_v17 = vpop.f32.mrb[15].mxu0  ;;  %1228 = vmatmul.mubr.bf16.gmra.mrb[8].mxu1 %v672_v9  ;;  %v649_v19 = vmax.f32 %v565_v12, 0.0 }
 0x179   : > { %v560_v18 = vadd.f32 %v1764_v32, %v559_v17  ;;  %v647_v21 = vmax.f32 %v557_v14, 0.0 }
 0x17a   : > { %v650_v20 = vmax.f32 %v568_v16, 0.0 }
 0x17b   : > { %v648_v22 = vmax.f32 %v560_v18, 0.0  ;;  %v1802_v18 = vld [vmem:[%s1925_s4] ss:$0 sm:$0xff] }
 0x17c   : > { %v674_v23 = vpack.c.bf16 %v650_v20, %v649_v19 }
 0x17d   : > { %v673_v24 = vpack.c.bf16 %v648_v22, %v647_v21  ;;  %v1189_v25 = vpop.f32.mrb[16].mxu0 }
 0x17e   : > { %v581_v26 = vadd.f32 %v1189_v25, %v1764_v32  ;;  %v572_v27 = vpop.f32.mrb[17].mxu0 }
 0x17f   : > { %v573_v28 = vadd.f32 %v1764_v32, %v572_v27  ;;  %v1190_v29 = vpop.f32.mrb[18].mxu0  ;;  %1231 = vmatprep.mubr.bf16.mxu1 %v673_v24 }
 0x180   : > { %v584_v30 = vadd.f32 %v1190_v29, %v1764_v32  ;;  %v575_v31 = vpop.f32.mrb[19].mxu0  ;;  %1232 = vmatmul.mubr.bf16.gmra.mrb[12].mxu1 %v674_v23  ;;  %v653_v34 = vmax.f32 %v581_v26, 0.0 }
 0x181   : > { %v576_v33 = vadd.f32 %v1764_v32, %v575_v31  ;;  %v651_v36 = vmax.f32 %v573_v28, 0.0 }
 0x182   : > { %v654_v35 = vmax.f32 %v584_v30, 0.0 }
 0x183   : > { %v652_v37 = vmax.f32 %v576_v33, 0.0 }
 0x184   : > { %v676_v38 = vpack.c.bf16 %v654_v35, %v653_v34 }
 0x185   : > { %v675_v39 = vpack.c.bf16 %v652_v37, %v651_v36  ;;  %v1193_v40 = vpop.f32.mrb[20].mxu0 }
 0x186   : > { %v597_v41 = vadd.f32 %v1193_v40, %v1764_v32  ;;  %v588_v42 = vpop.f32.mrb[21].mxu0 }
 0x187   : > { %v589_v43 = vadd.f32 %v1764_v32, %v588_v42  ;;  %v1194_v44 = vpop.f32.mrb[22].mxu0  ;;  %1235 = vmatprep.mubr.bf16.mxu1 %v675_v39 }
 0x188   : > { %v600_v45 = vadd.f32 %v1194_v44, %v1764_v32  ;;  %v591_v46 = vpop.f32.mrb[23].mxu0  ;;  %1236 = vmatmul.mubr.bf16.gmra.mrb[16].mxu1 %v676_v38  ;;  %v657_v48 = vmax.f32 %v597_v41, 0.0 }
 0x189   : > { %v592_v47 = vadd.f32 %v1764_v32, %v591_v46  ;;  %v655_v50 = vmax.f32 %v589_v43, 0.0 }
 0x18a   : > { %v658_v49 = vmax.f32 %v600_v45, 0.0 }
 0x18b   : > { %v656_v51 = vmax.f32 %v592_v47, 0.0 }
 0x18c   : > { %v678_v52 = vpack.c.bf16 %v658_v49, %v657_v48 }
 0x18d   : > { %v677_v53 = vpack.c.bf16 %v656_v51, %v655_v50  ;;  %v1197_v54 = vpop.f32.mrb[24].mxu0 }
 0x18e   : > { %v613_v55 = vadd.f32 %v1197_v54, %v1764_v32  ;;  %v604_v56 = vpop.f32.mrb[25].mxu0 }
 0x18f   : > { %v605_v57 = vadd.f32 %v1764_v32, %v604_v56  ;;  %v1198_v58 = vpop.f32.mrb[26].mxu0  ;;  %1239 = vmatprep.mubr.bf16.mxu1 %v677_v53 }
 0x190   : > { %v616_v59 = vadd.f32 %v1198_v58, %v1764_v32  ;;  %v607_v60 = vpop.f32.mrb[27].mxu0  ;;  %1240 = vmatmul.mubr.bf16.gmra.mrb[20].mxu1 %v678_v52  ;;  %v661_v62 = vmax.f32 %v613_v55, 0.0 }
 0x191   : > { %v608_v61 = vadd.f32 %v1764_v32, %v607_v60  ;;  %v659_v0 = vmax.f32 %v605_v57, 0.0 }
 0x192   : > { %v662_v63 = vmax.f32 %v616_v59, 0.0 }
 0x193   : > { %v660_v1 = vmax.f32 %v608_v61, 0.0 }
 0x194   : > { %v680_v2 = vpack.c.bf16 %v662_v63, %v661_v62 }
 0x195   : > { %v679_v3 = vpack.c.bf16 %v660_v1, %v659_v0  ;;  %v1201_v4 = vpop.f32.mrb[28].mxu0 }
 0x196   : > { %v629_v5 = vadd.f32 %v1201_v4, %v1764_v32  ;;  %v620_v6 = vpop.f32.mrb[29].mxu0 }
 0x197   : > { %v621_v7 = vadd.f32 %v1764_v32, %v620_v6  ;;  %v1202_v8 = vpop.f32.mrb[30].mxu0  ;;  %1243 = vmatprep.mubr.bf16.mxu1 %v679_v3 }
 0x198   : > { %v632_v9 = vadd.f32 %v1202_v8, %v1764_v32  ;;  %v623_v10 = vpop.f32.mrb[31].mxu0  ;;  %1244 = vmatmul.mubr.bf16.gmra.mrb[24].mxu1 %v680_v2  ;;  %v665_v12 = vmax.f32 %v629_v5, 0.0 }
 0x199   : > { %v624_v11 = vadd.f32 %v1764_v32, %v623_v10  ;;  %v663_v14 = vmax.f32 %v621_v7, 0.0 }
 0x19a   : > { %v666_v13 = vmax.f32 %v632_v9, 0.0 }
 0x19b   : > { %v664_v15 = vmax.f32 %v624_v11, 0.0 }
 0x19c   : > { %v682_v16 = vpack.c.bf16 %v666_v13, %v665_v12 }
 0x19d   : > { %v681_v17 = vpack.c.bf16 %v664_v15, %v663_v14 }
 0x19f   : > { %1247 = vmatprep.mubr.bf16.mxu1 %v681_v17 }
 0x1a0   : > { %1248 = vmatmul.mubr.bf16.gmra.mrb[28].mxu1 %v682_v16 }
 0x23b   : > { %v1221_v19 = vpop.f32.mrb[0].mxu1 }
 0x23c   : > { %v797_v20 = vadd.f32 %v1221_v19, %v1802_v18  ;;  %v788_v21 = vpop.f32.mrb[1].mxu1 }
 0x23d   : > { %v789_v32 = vadd.f32 %v1802_v18, %v788_v21  ;;  %v1222_v22 = vpop.f32.mrb[2].mxu1 }
 0x23e   : > { %917 = vst [vmem:[%s1806_s28 + $0x10] sm:$0xff] %v797_v20  ;;  %v800_v23 = vadd.f32 %v1222_v22, %v1802_v18  ;;  %v791_v24 = vpop.f32.mrb[3].mxu1 }
 0x23f   : > { %915 = vst [vmem:[%s1806_s28] sm:$0xff] %v789_v32  ;;  %v792_v25 = vadd.f32 %v1802_v18, %v791_v24 }
 0x240   : > { %918 = vst [vmem:[%s1806_s28 + $0x18] sm:$0xff] %v800_v23 }
 0x241   : > { %916 = vst [vmem:[%s1806_s28 + $0x8] sm:$0xff] %v792_v25 }
 0x243   : > { %v1225_v26 = vpop.f32.mrb[4].mxu1 }
 0x244   : > { %v813_v27 = vadd.f32 %v1225_v26, %v1802_v18  ;;  %v804_v28 = vpop.f32.mrb[5].mxu1 }
 0x245   : > { %v805_v29 = vadd.f32 %v1802_v18, %v804_v28  ;;  %v1226_v30 = vpop.f32.mrb[6].mxu1 }
 0x246   : > { %921 = vst [vmem:[%s1806_s28 + $0x30] sm:$0xff] %v813_v27  ;;  %v816_v31 = vadd.f32 %v1226_v30, %v1802_v18  ;;  %v807_v33 = vpop.f32.mrb[7].mxu1 }
 0x247   : > { %919 = vst [vmem:[%s1806_s28 + $0x20] sm:$0xff] %v805_v29  ;;  %v808_v34 = vadd.f32 %v1802_v18, %v807_v33 }
 0x248   : > { %922 = vst [vmem:[%s1806_s28 + $0x38] sm:$0xff] %v816_v31 }
 0x249   : > { %920 = vst [vmem:[%s1806_s28 + $0x28] sm:$0xff] %v808_v34 }
 0x24b   : > { %v1229_v35 = vpop.f32.mrb[8].mxu1 }
 0x24c   : > { %v829_v36 = vadd.f32 %v1229_v35, %v1802_v18  ;;  %v820_v37 = vpop.f32.mrb[9].mxu1 }
 0x24d   : > { %v821_v38 = vadd.f32 %v1802_v18, %v820_v37  ;;  %v1230_v39 = vpop.f32.mrb[10].mxu1 }
 0x24e   : > { %925 = vst [vmem:[%s1806_s28 + $0x50] sm:$0xff] %v829_v36  ;;  %v832_v40 = vadd.f32 %v1230_v39, %v1802_v18  ;;  %v823_v41 = vpop.f32.mrb[11].mxu1 }
 0x24f   : > { %923 = vst [vmem:[%s1806_s28 + $0x40] sm:$0xff] %v821_v38  ;;  %v824_v42 = vadd.f32 %v1802_v18, %v823_v41 }
 0x250   : > { %926 = vst [vmem:[%s1806_s28 + $0x58] sm:$0xff] %v832_v40 }
 0x251   : > { %924 = vst [vmem:[%s1806_s28 + $0x48] sm:$0xff] %v824_v42 }
 0x253   : > { %v1233_v43 = vpop.f32.mrb[12].mxu1 }
 0x254   : > { %v845_v44 = vadd.f32 %v1233_v43, %v1802_v18  ;;  %v836_v45 = vpop.f32.mrb[13].mxu1 }
 0x255   : > { %v837_v46 = vadd.f32 %v1802_v18, %v836_v45  ;;  %v1234_v47 = vpop.f32.mrb[14].mxu1 }
 0x256   : > { %929 = vst [vmem:[%s1806_s28 + $0x70] sm:$0xff] %v845_v44  ;;  %v848_v48 = vadd.f32 %v1234_v47, %v1802_v18  ;;  %v839_v49 = vpop.f32.mrb[15].mxu1 }
 0x257   : > { %927 = vst [vmem:[%s1806_s28 + $0x60] sm:$0xff] %v837_v46  ;;  %v840_v50 = vadd.f32 %v1802_v18, %v839_v49 }
 0x258   : > { %930 = vst [vmem:[%s1806_s28 + $0x78] sm:$0xff] %v848_v48 }
 0x259   : > { %928 = vst [vmem:[%s1806_s28 + $0x68] sm:$0xff] %v840_v50 }
 0x25b   : > { %v1237_v51 = vpop.f32.mrb[16].mxu1 }
 0x25c   : > { %v861_v52 = vadd.f32 %v1237_v51, %v1802_v18  ;;  %v852_v53 = vpop.f32.mrb[17].mxu1 }
 0x25d   : > { %v853_v54 = vadd.f32 %v1802_v18, %v852_v53  ;;  %v1238_v55 = vpop.f32.mrb[18].mxu1 }
 0x25e   : > { %933 = vst [vmem:[%s1806_s28 + $0x90] sm:$0xff] %v861_v52  ;;  %v864_v56 = vadd.f32 %v1238_v55, %v1802_v18  ;;  %v855_v57 = vpop.f32.mrb[19].mxu1 }
 0x25f   : > { %931 = vst [vmem:[%s1806_s28 + $0x80] sm:$0xff] %v853_v54  ;;  %v856_v58 = vadd.f32 %v1802_v18, %v855_v57 }
 0x260   : > { %934 = vst [vmem:[%s1806_s28 + $0x98] sm:$0xff] %v864_v56 }
 0x261   : > { %932 = vst [vmem:[%s1806_s28 + $0x88] sm:$0xff] %v856_v58 }
 0x263   : > { %v1241_v59 = vpop.f32.mrb[20].mxu1 }
 0x264   : > { %v877_v60 = vadd.f32 %v1241_v59, %v1802_v18  ;;  %v868_v61 = vpop.f32.mrb[21].mxu1 }
 0x265   : > { %v869_v62 = vadd.f32 %v1802_v18, %v868_v61  ;;  %v1242_v63 = vpop.f32.mrb[22].mxu1 }
 0x266   : > { %937 = vst [vmem:[%s1806_s28 + $0xb0] sm:$0xff] %v877_v60  ;;  %v880_v0 = vadd.f32 %v1242_v63, %v1802_v18  ;;  %v871_v1 = vpop.f32.mrb[23].mxu1 }
 0x267   : > { %935 = vst [vmem:[%s1806_s28 + $0xa0] sm:$0xff] %v869_v62  ;;  %v872_v2 = vadd.f32 %v1802_v18, %v871_v1 }
 0x268   : > { %938 = vst [vmem:[%s1806_s28 + $0xb8] sm:$0xff] %v880_v0 }
 0x269   : > { %936 = vst [vmem:[%s1806_s28 + $0xa8] sm:$0xff] %v872_v2 }
 0x26b   : > { %v1245_v3 = vpop.f32.mrb[24].mxu1 }
 0x26c   : > { %v893_v4 = vadd.f32 %v1245_v3, %v1802_v18  ;;  %v884_v5 = vpop.f32.mrb[25].mxu1 }
 0x26d   : > { %v885_v6 = vadd.f32 %v1802_v18, %v884_v5  ;;  %v1246_v7 = vpop.f32.mrb[26].mxu1 }
 0x26e   : > { %941 = vst [vmem:[%s1806_s28 + $0xd0] sm:$0xff] %v893_v4  ;;  %v896_v8 = vadd.f32 %v1246_v7, %v1802_v18  ;;  %v887_v9 = vpop.f32.mrb[27].mxu1 }
 0x26f   : > { %939 = vst [vmem:[%s1806_s28 + $0xc0] sm:$0xff] %v885_v6  ;;  %v888_v10 = vadd.f32 %v1802_v18, %v887_v9 }
 0x270   : > { %942 = vst [vmem:[%s1806_s28 + $0xd8] sm:$0xff] %v896_v8 }
 0x271   : > { %940 = vst [vmem:[%s1806_s28 + $0xc8] sm:$0xff] %v888_v10 }
 0x273   : > { %v1249_v11 = vpop.f32.mrb[28].mxu1 }
 0x274   : > { %v909_v12 = vadd.f32 %v1249_v11, %v1802_v18  ;;  %v900_v13 = vpop.f32.mrb[29].mxu1 }
 0x275   : > { %v901_v14 = vadd.f32 %v1802_v18, %v900_v13  ;;  %v1250_v15 = vpop.f32.mrb[30].mxu1 }
 0x276   : > { %945 = vst [vmem:[%s1806_s28 + $0xf0] sm:$0xff] %v909_v12  ;;  %v912_v16 = vadd.f32 %v1250_v15, %v1802_v18  ;;  %v903_v17 = vpop.f32.mrb[31].mxu1 }
 0x277   : > { %943 = vst [vmem:[%s1806_s28 + $0xe0] sm:$0xff] %v901_v14  ;;  %v904_v19 = vadd.f32 %v1802_v18, %v903_v17 }
 0x278   : > { %946 = vst [vmem:[%s1806_s28 + $0xf8] sm:$0xff] %v912_v16 }
 0x279   : > { %944 = vst [vmem:[%s1806_s28 + $0xe8] sm:$0xff] %v904_v19 }
 0x27a   : > { %1453 = shalt.err (!%p1450_p1)
}
 0x27b   : > { %s1454_s24 = scalar_lea.hbm %s1871_s17, 4096  ;;  %s1458_s16 = scalar_lea.hbm %s1926_s5, 8192 }
 0x27c   : > { %p1455_p13 = scmp.ne.s32.totalorder %s1871_s17, %s1454_s24  ;;  %p1459_p4 = scmp.lt.u32.totalorder %s1871_s17, %s1926_s5 }
 0x27d   : > { %p1460_p5 = scmp.lt.u32.totalorder %s1458_s16, %s1454_s24  ;;  %p1462_p11 = scmp.lt.u32.totalorder %s1454_s24, %s1871_s17 }
 0x27e   : > { %p1456_p6 = pnand %p1455_p13, %p1940_p0 }
 0x27f   : > { %p1461_p8 = por %p1460_p5, %p1459_p4 }
 0x280   : > { %p1457_p10 = pneg %p1456_p6 }
 0x281   : > { %p1463_p2 = por %p1462_p11, %p1461_p8 }
 0x283   : > { %p1464_p3 = pnand %p1463_p2, %p1457_p10 }
 0x285   : > { %1467 = shalt.err (!%p1464_p3)
}
 0x286   : > { %s1518_s12 = smov 128   ;;  %s1519_s30 = smov 8  }
 0x287   : > { %1261 = dma.vmem_to_hbm [thread:$0]  (%p1940_p0), %s1873_s13, 4096, %s1871_s17, %s948_s22, %s1518_s12, %s1518_s12, %s1519_s30  }
 0x288 PF: > { %s976_s11 = sand.u32 1, %s1498_s18   ;;  %p1941_p7 = scmp.ne.s32.totalorder %s1931_s25, 0 }
 0x289   : > { %p1942_p9 = scmp.ge.s32.totalorder %s1510_s21, 2  ;;  %s977_s7 = scalar_lea.sflag [#allocation4], %s976_s11 }
 0x28b   : > { %p1275_p12 = pnand %p1942_p9, %p1941_p7 }
 0x28d   : > { %1493 = dma.done.wait (!%p1275_p12), %s977_s7, 4096  }
 0x28e   : > { %1495 = vsyncadd (!%p1275_p12), %s977_s7, 4294963200  ;;  %p19_p1 = scmp.ge.s32.totalorder %s1666_s29, 4   ;;  %s1943_s18 = smov %s1502_s19 }
 0x28f   : > { %s1944_s19 = smov %s1506_s20  ;;  %s1945_s20 = smov %s1682_s27 }
 0x290   : > { %s1946_s21 = smov %s1666_s29  ;;  %21 = sbr.rel (!%p19_p1) target bundleno = 6 (0x6), region = 93 }
 0x297   :  { %982 = vsyncpa [#allocation3], 1 }
 0x298   :  { %984 = vsyncpa [#allocation3 + $0x1], 1 }
 0x299   :  { %985 = vsyncpa [#allocation6], 1 }
 0x29a   :  { %986 = vsyncpa [#allocation4], 1 }
 0x29b   :  { %988 = vsyncpa [#allocation4 + $0x1], 1 }

</bundles_post_ra>
